<compile_context>
chip_gen: v6e
topology: v6e:2x2x1
jax: 0.10.0
libtpu: 0.0.40
codegen_flags: <defaults>
</compile_context>

<pallas_src>
import functools

import jax
import jax.numpy as jnp
from jax.experimental import pallas as pl
from jax.experimental.pallas import tpu as pltpu


def _cdiv(a, b):
    return -(-a // b)


def _round_up(x, m):
    return _cdiv(x, m) * m


# --------------------------------------------------------------------------- #
# Kernel
# --------------------------------------------------------------------------- #
def _box_distance_kernel(prop_ref, pred_ref, out_ref, *, box_distance_type,
                         transport_lambda):
    """prop_ref / pred_ref: (32, TN) tiles of the dense coord-major view.

    Row layout of the (32, K) view of a coord-major [4, M] array (K = M / 8):
        row 8*c + q, column j   <->   coordinate c of box m = q*K + j
    Summing the four 8-sublane groups therefore reduces over the 4 coordinates
    of each box with three whole-vreg VPU adds (no XLU, no masking), and the
    (8, TN) output stays sublane- and lane-dense.
    """
    diff = prop_ref[...].astype(jnp.float32) - pred_ref[...].astype(jnp.float32)
    if box_distance_type == "l1":
        d = jnp.abs(diff)
    else:  # "l2" (validated in the wrapper)
        d = diff * diff
    dist = (d[0:8, :] + d[8:16, :]) + (d[16:24, :] + d[24:32, :])   # (8, TN)
    out_ref[...] = (dist * transport_lambda).astype(out_ref.dtype)


# --------------------------------------------------------------------------- #
# Wrapper
# --------------------------------------------------------------------------- #
def _choose_lane_tile(K, cap):
    """Lane-tile width over the (32, K) view (K = total_boxes / 8)."""
    cap = max(128, cap - cap % 128)
    if K <= cap and K <= 1024:
        return K                       # one exact full-extent tile, grid = 1
    # Aim for >= 4 grid steps (pipeline overlap + lets v7x split the parallel
    # axis across both TensorCores) but keep tiles lane-dense and >= 512 wide
    # (mem-bound throughput falls to ~29% of roofline at 128-wide tiles).
    tn = _round_up(_cdiv(K, 4), 128)
    tn = min(tn, cap)
    tn = max(tn, min(512, cap))
    return tn


def box_distances_pallas(proposal_cmajor, pred_cmajor, *, box_distance_type,
                         transport_lambda, lane_tile_cap=16384,
                         min_pallas_boxes=16384, out_dtype=jnp.float32):
    """Coord-major boxes [4, B, N] -> distances [B, N].

    Inputs must be coord-major so the kernel streams them without any extra
    HBM transpose pass.  bf16 inputs are accepted (kernel upcasts to f32);
    keep f32 inputs for exact parity with the PyTorch module.
    """
    if box_distance_type not in ("l1", "l2"):
        raise ValueError(f"Unsupported box_distance_type {box_distance_type!r}")
    C, B, N = proposal_cmajor.shape
    assert C == 4 and pred_cmajor.shape == (4, B, N)
    M = B * N
    lam = float(transport_lambda)

    if M == 0:
        return jnp.zeros((B, N), out_dtype)

    # Small-problem dispatch: below ~one tile of boxes the fused XLA expression
    # matches/beats the kernel (no DMA/compute overlap to win, launch-bound).
    if M < min_pallas_boxes:
        diff = (proposal_cmajor.astype(jnp.float32)
                - pred_cmajor.astype(jnp.float32))
        d = jnp.abs(diff) if box_distance_type == "l1" else diff * diff
        return (d.sum(axis=0) * lam).astype(out_dtype)

    # Free contiguous reshapes (row-major, no data movement):
    #   [4, B, N] -> [4, M] -> [32, M/8]  (fully 8-sublane / 128-lane dense).
    prop2 = proposal_cmajor.reshape(4, M)
    pred2 = pred_cmajor.reshape(4, M)
    M8 = _round_up(M, 8)
    if M8 != M:
        # TODO(synk): total box counts that aren't a multiple of 8 pay one small
        # pad copy here; fold the pad into the upstream stack to keep this free.
        prop2 = jnp.pad(prop2, ((0, 0), (0, M8 - M)))
        pred2 = jnp.pad(pred2, ((0, 0), (0, M8 - M)))
    K = M8 // 8
    prop32 = prop2.reshape(32, K)
    pred32 = pred2.reshape(32, K)

    tn = _choose_lane_tile(K, lane_tile_cap)
    grid = (_cdiv(K, tn),)   # partial last block handled by Pallas boundary masking

    kernel = functools.partial(
        _box_distance_kernel,
        box_distance_type=box_distance_type,
        transport_lambda=lam,
    )

    out = pl.pallas_call(
        kernel,
        out_shape=jax.ShapeDtypeStruct((8, K), out_dtype),
        grid=grid,
        in_specs=[
            pl.BlockSpec((32, tn), lambda i: (0, i)),
            pl.BlockSpec((32, tn), lambda i: (0, i)),
        ],
        out_specs=pl.BlockSpec((8, tn), lambda i: (0, i)),
        compiler_params=pltpu.CompilerParams(
            dimension_semantics=("parallel",),   # v7x: shard across both TCs
        ),
    )(prop32, pred32)

    # Row-major flatten of (8, K) restores box order (flat index q*K + j == m).
    out = out.reshape(M8)
    if M8 != M:
        out = out[:M]
    return out.reshape(B, N)


# --------------------------------------------------------------------------- #
# Module (forward-only port of the PyTorch BoxDistanceLoss)
# --------------------------------------------------------------------------- #
class BoxDistanceLoss:
    def __init__(self, *, box_distance_type: str, transport_lambda: float,
                 check_finite: bool = True, min_pallas_boxes: int = 16384,
                 lane_tile_cap: int = 16384):
        self.box_distance_type = box_distance_type
        self.transport_lambda = transport_lambda
        self.check_finite = check_finite
        self.min_pallas_boxes = min_pallas_boxes
        self.lane_tile_cap = lane_tile_cap

    def forward(self, batched_inputs):
        # Stack the per-image [N, 4] boxes directly into coord-major [4, B, N];
        # the transpose is folded into the (unavoidable) stack copy instead of
        # being a separate HBM pass in front of the kernel.
        prop = jnp.stack(
            [jnp.asarray(bi["proposal_boxes"]).T for bi in batched_inputs], axis=1)
        pred = jnp.stack(
            [jnp.asarray(bi["pred_boxes"]).T for bi in batched_inputs], axis=1)

        distances = box_distances_pallas(
            prop, pred,
            box_distance_type=self.box_distance_type,
            transport_lambda=self.transport_lambda,
            lane_tile_cap=self.lane_tile_cap,
            min_pallas_boxes=self.min_pallas_boxes,
        )  # [B, N]

        for bi, d in zip(batched_inputs, distances):
            loss_dict = bi["loss_dict"]
            if bi["instances"]["gt_boxes"].shape[0] != 0:
                if "transport_loss" in loss_dict:
                    loss_dict["transport_loss"] = loss_dict["transport_loss"] + d
                else:
                    loss_dict["transport_loss"] = d

        if self.check_finite:
            # One batched device->host sync for the whole batch (PyTorch module
            # syncs once per image).  bool() on a tracer would raise under
            # jax.jit; disable check_finite or hoist the check when jitting.
            # TODO(synk): PyTorch calls breakpoint() on non-finite; we raise.
            if not bool(jnp.isfinite(distances).all()):
                raise FloatingPointError("non-finite transport distances")
        return batched_inputs

    __call__ = forward


# --------------------------------------------------------------------------- #
# Demo / self-check
# --------------------------------------------------------------------------- #
if __name__ == "__main__":
    B, N = 2, 128

    key = jax.random.PRNGKey(0)
    k1, k2 = jax.random.split(key)
    proposal = jax.random.normal(k1, (B, N, 4), dtype=jnp.float32) * 10.0
    pred = jax.random.normal(k2, (B, N, 4), dtype=jnp.float32) * 10.0

    # Pure-JAX references.
    ref_l1 = jnp.abs(proposal - pred).sum(-1) * 0.5
    ref_l2 = jnp.square(proposal - pred).sum(-1) * 0.5

    prop_cm = jnp.transpose(proposal, (2, 0, 1))
    pred_cm = jnp.transpose(pred, (2, 0, 1))

    # Direct kernel checks (min_pallas_boxes=0 forces the Pallas path at small M).
    d_l1 = jax.block_until_ready(box_distances_pallas(
        prop_cm, pred_cm, box_distance_type="l1", transport_lambda=0.5,
        min_pallas_boxes=0))
    d_l2 = jax.block_until_ready(box_distances_pallas(
        prop_cm, pred_cm, box_distance_type="l2", transport_lambda=0.5,
        min_pallas_boxes=0))
    assert jnp.allclose(d_l1, ref_l1, atol=1e-5, rtol=1e-5)
    assert jnp.allclose(d_l2, ref_l2, atol=1e-4, rtol=1e-5)

    # Total box count not a multiple of 8 -> tiny pad path.
    Np = 99
    d_pad = jax.block_until_ready(box_distances_pallas(
        prop_cm[:, :, :Np], pred_cm[:, :, :Np],
        box_distance_type="l1", transport_lambda=0.5, min_pallas_boxes=0))
    assert jnp.allclose(d_pad, ref_l1[:, :Np], atol=1e-5, rtol=1e-5)

    # Multi-tile grid with a partial last block (forced 128-lane tiles):
    # M = 4800 boxes -> K = 600 lanes -> grid of 5, last block 88 valid lanes.
    Bt, Nt = 2, 2400
    kp1, kp2 = jax.random.split(jax.random.PRNGKey(1))
    pro_t = jax.random.normal(kp1, (Bt, Nt, 4), jnp.float32) * 10.0
    pre_t = jax.random.normal(kp2, (Bt, Nt, 4), jnp.float32) * 10.0
    d_t = jax.block_until_ready(box_distances_pallas(
        jnp.transpose(pro_t, (2, 0, 1)), jnp.transpose(pre_t, (2, 0, 1)),
        box_distance_type="l2", transport_lambda=0.25,
        lane_tile_cap=128, min_pallas_boxes=0))
    ref_t = jnp.square(pro_t - pre_t).sum(-1) * 0.25
    assert jnp.allclose(d_t, ref_t, atol=1e-3, rtol=1e-5)

    # Module semantics: first image gets transport_loss, second (no gt) does not.
    batched_inputs = []
    for b in range(B):
        batched_inputs.append(
            {
                "proposal_boxes": proposal[b],           # per-image [N, 4]
                "pred_boxes": pred[b],
                "instances": {
                    "gt_boxes": jnp.zeros((3, 4), jnp.float32)
                    if b == 0 else jnp.zeros((0, 4), jnp.float32)
                },
                "loss_dict": {},
            }
        )
    module = BoxDistanceLoss(box_distance_type="l1", transport_lambda=0.5,
                             min_pallas_boxes=0)   # exercise the Pallas path
    out = module(batched_inputs)
    assert "transport_loss" in out[0]["loss_dict"]
    assert "transport_loss" not in out[1]["loss_dict"]
    tl0 = jax.block_until_ready(out[0]["loss_dict"]["transport_loss"])
    assert jnp.allclose(tl0, ref_l1[0], atol=1e-5, rtol=1e-5)

    print("KERNEL_OK")
</pallas_src>

<mosaic_0001>
module attributes {stable_mosaic.version = 11 : i64} {
  func.func @_box_distance_kernel(%arg0: i32, %arg1: memref<32x32xf32, #tpu.memory_space<vmem>>, %arg2: memref<32x32xf32, #tpu.memory_space<vmem>>, %arg3: memref<8x32xf32, #tpu.memory_space<vmem>>) attributes {dimension_semantics = [#tpu.dimension_semantics<parallel>], iteration_bounds = array<i64: 1>, scalar_prefetch = 0 : i64, scratch_operands = 0 : i64, tpu.core_type = #tpu.core_type<tc>, window_params = [{transform_indices = @transform_0, window_bounds = array<i64: 32, 32>}, {transform_indices = @transform_1, window_bounds = array<i64: 32, 32>}, {transform_indices = @transform_2, window_bounds = array<i64: 8, 32>}]} {
    %c0 = arith.constant 0 : index
    %c0_0 = arith.constant 0 : index
    %0 = vector.load %arg1[%c0, %c0_0] : memref<32x32xf32, #tpu.memory_space<vmem>>, vector<32x32xf32>
    %c0_1 = arith.constant 0 : index
    %c0_2 = arith.constant 0 : index
    %1 = vector.load %arg2[%c0_1, %c0_2] : memref<32x32xf32, #tpu.memory_space<vmem>>, vector<32x32xf32>
    %2 = arith.subf %0, %1 : vector<32x32xf32>
    %3 = math.absf %2 : vector<32x32xf32>
    %4 = vector.extract_strided_slice %3 {offsets = [0, 0], sizes = [8, 32], strides = [1, 1]} : vector<32x32xf32> to vector<8x32xf32>
    %5 = vector.extract_strided_slice %3 {offsets = [8, 0], sizes = [8, 32], strides = [1, 1]} : vector<32x32xf32> to vector<8x32xf32>
    %6 = arith.addf %4, %5 : vector<8x32xf32>
    %7 = vector.extract_strided_slice %3 {offsets = [16, 0], sizes = [8, 32], strides = [1, 1]} : vector<32x32xf32> to vector<8x32xf32>
    %8 = vector.extract_strided_slice %3 {offsets = [24, 0], sizes = [8, 32], strides = [1, 1]} : vector<32x32xf32> to vector<8x32xf32>
    %9 = arith.addf %7, %8 : vector<8x32xf32>
    %10 = arith.addf %6, %9 : vector<8x32xf32>
    %cst = arith.constant 5.000000e-01 : f32
    %11 = vector.broadcast %cst : f32 to vector<8x32xf32>
    %12 = arith.mulf %10, %11 : vector<8x32xf32>
    %c0_3 = arith.constant 0 : index
    %c0_4 = arith.constant 0 : index
    %13 = vector.load %arg3[%c0_3, %c0_4] : memref<8x32xf32, #tpu.memory_space<vmem>>, vector<8x32xf32>
    tpu.vector_store %arg3[%c0_3, %c0_4], %12 {strides = array<i32>} : memref<8x32xf32, #tpu.memory_space<vmem>>, vector<8x32xf32>,
    return
  }
  func.func @transform_0(%arg0: i32) -> (i32, i32) {
    %c0_i32 = arith.constant 0 : i32
    %c0_i32_0 = arith.constant 0 : i32
    return %c0_i32, %arg0 : i32, i32
  }
  func.func @transform_1(%arg0: i32) -> (i32, i32) {
    %c0_i32 = arith.constant 0 : i32
    %c0_i32_0 = arith.constant 0 : i32
    return %c0_i32, %arg0 : i32, i32
  }
  func.func @transform_2(%arg0: i32) -> (i32, i32) {
    %c0_i32 = arith.constant 0 : i32
    %c0_i32_0 = arith.constant 0 : i32
    return %c0_i32, %arg0 : i32, i32
  }
}

</mosaic_0001>

<bundles_post_ra>
// kernel: tpu_custom_call.1
= control target key start
LH: loop header
LB: loop body
LE: loop exit
PB: predicated region body
PF: predicated region fallthrough
CT: control target
= control target key end

     0   :  { %7 = vsyncpa [#allocation3], 0  ;;  %s178_s0 = inlined_call_operand.hbm [shape: f32[32,32], index: 0, kind: input, shape index: {}]   ;;  %s179_s1 = inlined_call_operand.hbm [shape: f32[32,32], index: 1, kind: input, shape index: {}]   ;;  %s180_s2 = inlined_call_operand.hbm [shape: f32[8,32], index: 2, kind: output, shape index: {}]  }
   0x1   :  { %8 = vsyncpa [#allocation6], 0 }
   0x2   :  { %9 = vsyncpa [#allocation4], 0  ;;  %s149_s9 = smov [#allocation2]  }
   0x3   :  { %s15_s10 = sshll.u32 %s149_s9, 4  ;;  %s16_s10 = int_to_ptr.vmem [resolvable:$true] %s15_s10 }
   0x4   :  { %s91_s11 = scalar_lea.vmem %s16_s10, 512  ;;  %p96_p1 = scmp.lt.s32.totalorder %s16_s10, %s16_s10 }
   0x5   :  { %p92_p0 = scmp.ne.s32.totalorder %s16_s10, %s91_s11  ;;  %p97_p2 = scmp.lt.s32.totalorder %s91_s11, %s91_s11 }
   0x7   :  { %p98_p3 = por %p97_p2, %p96_p1 }
   0x9   :  { %p99_p4 = pnand %p98_p3, %p92_p0 }
   0xb   :  { %102 = shalt.err (!%p99_p4)
}
   0xc   :  { %s150_s12 = smov 128   ;;  %s151_s13 = smov 8  }
   0xd   :  { %21 = dma.hbm_to_vmem [thread:$0]  %s178_s0, 512, %s16_s10, [#allocation3], %s150_s12, %s150_s12, %s151_s13  }
   0xe   :  { %s152_s16 = smov [#allocation5]  }
   0xf   :  { %s27_s17 = sshll.u32 %s152_s16, 4  ;;  %s28_s17 = int_to_ptr.vmem [resolvable:$true] %s27_s17 }
  0x10   :  { %s111_s18 = scalar_lea.vmem %s28_s17, 512  ;;  %p116_p6 = scmp.lt.s32.totalorder %s28_s17, %s28_s17 }
  0x11   :  { %p112_p5 = scmp.ne.s32.totalorder %s28_s17, %s111_s18  ;;  %p117_p7 = scmp.lt.s32.totalorder %s111_s18, %s111_s18 }
  0x13   :  { %p118_p8 = por %p117_p7, %p116_p6 }
  0x15   :  { %p119_p9 = pnand %p118_p8, %p112_p5 }
  0x17   :  { %122 = shalt.err (!%p119_p9)
}
  0x18   :  { %33 = dma.hbm_to_vmem [thread:$0]  %s179_s1, 512, %s28_s17, [#allocation6], %s150_s12, %s150_s12, %s151_s13  }
  0x19   :  { %143 = dma.done.wait [#allocation3], 512  }
  0x1a   :  { %144 = vsyncadd [#allocation3], 4294966784 }
  0x1b   :  { %145 = dma.done.wait [#allocation6], 512  }
  0x1c   :  { %146 = vsyncadd [#allocation6], 4294966784  ;;  %v40_v0 = vld [vmem:[#allocation2] sm:$0xff]  ;;  %v41_v1 = vld [vmem:[#allocation2 + $0x8] sm:$0xff]  ;;  %s153_s0 = smov [#allocation7]   ;;  %vm60_vm0 = vcmask 261120  }
  0x1d   :  { %v42_v2 = vld [vmem:[#allocation2 + $0x10] sm:$0xff]  ;;  %v43_v3 = vld [vmem:[#allocation2 + $0x18] sm:$0xff]  ;;  %v44_v4 = vld [vmem:[#allocation5] sm:$0xff]  ;;  %s68_s1 = sshll.u32 %s153_s0, 4  ;;  %s69_s1 = int_to_ptr.vmem [resolvable:$true] %s68_s1 }
  0x1e   :  { %v45_v5 = vld [vmem:[#allocation5 + $0x8] sm:$0xff]  ;;  %v46_v6 = vld [vmem:[#allocation5 + $0x10] sm:$0xff]  ;;  %v47_v7 = vld [vmem:[#allocation5 + $0x18] sm:$0xff]  ;;  %v48_v8 = vsub.f32 %v40_v0, %v44_v4  ;;  %s123_s21 = scalar_lea.vmem %s69_s1, 128  ;;  %p128_p11 = scmp.lt.s32.totalorder %s69_s1, %s69_s1 }
  0x1f   :  { %v49_v9 = vsub.f32 %v41_v1, %v45_v5  ;;  %v50_v10 = vsub.f32 %v42_v2, %v46_v6  ;;  %v51_v11 = vsub.f32 %v43_v3, %v47_v7  ;;  %p124_p10 = scmp.ne.s32.totalorder %s69_s1, %s123_s21  ;;  %p129_p12 = scmp.lt.s32.totalorder %s123_s21, %s123_s21 }
  0x20   :  { %v52_v12 = vand.u32 2147483647, %v48_v8 }
  0x21   :  { %v53_v13 = vand.u32 2147483647, %v49_v9  ;;  %v54_v14 = vand.u32 2147483647, %v50_v10  ;;  %v55_v15 = vand.u32 2147483647, %v51_v11  ;;  %p130_p13 = por %p129_p12, %p128_p11 }
  0x23   :  { %v56_v16 = vadd.f32 %v53_v13, %v52_v12  ;;  %v57_v17 = vadd.f32 %v55_v15, %v54_v14  ;;  %p131_p0 = pnand %p130_p13, %p124_p10 }
  0x25   :  { %v58_v18 = vadd.f32 %v57_v17, %v56_v16 }
  0x27   :  { %v59_v19 = vmul.f32 0.5, %v58_v18 }
  0x29   :  { %61 = vst.msk [vmem:[#allocation7] sm:$0xff] %vm60_vm0, %v59_v19 }
  0x2a   :  { %134 = shalt.err (!%p131_p0)
}
  0x2b   :  { %71 = dma.vmem_to_hbm [thread:$0]  %s69_s1, 128, %s180_s2, [#allocation4]  }
  0x2c   :  { %147 = dma.done.wait [#allocation4], 128  }
  0x2d   :  { %148 = vsyncadd [#allocation4], 4294967168 }
  0x2e   :  { %75 = vsyncpa [#allocation3], 1 }
  0x2f   :  { %76 = vsyncpa [#allocation6], 1 }
  0x30   :  { %77 = vsyncpa [#allocation4], 1 }

</bundles_post_ra>
